<compile_context>
chip_gen: v7x
topology: tpu7x:2x2x1
jax: 0.10.0
libtpu: 0.0.40
codegen_flags: <defaults>
</compile_context>

<pallas_src>
import functools
import math

import jax
import jax.numpy as jnp
from jax.experimental import pallas as pl
from jax.experimental.pallas import tpu as pltpu


_TARGET_BLOCK_BYTES = 4 << 20  # ~4 MiB blocks: near HBM roofline, amortizes
                               # the ~0.35 us per-grid-step overhead.


# ----------------------------------------------------------------------------
# Kernels
# ----------------------------------------------------------------------------

def _rot_flat_kernel(x_ref, o_ref):
    """Batched 2-D transpose with a lane-dense flattened store.

    x_ref: (bn, a, tb) block.  o_ref: (bn, tb*a) block (last dim full or a
    large multiple of 128 -> unmasked vector stores).
    """
    y = jnp.swapaxes(x_ref[...], 1, 2)            # (bn, tb, a): one XLU pass
    o_ref[...] = y.reshape(o_ref.shape)           # lane-dense store


def _general_flat_kernel(x_ref, o_ref, *, inner_perm):
    """General per-example permutation with a lane-dense flattened store."""
    # TODO(synk): decompose the rank-k transpose into 2-D transposes of
    # reshaped views to avoid stacked relayouts for exotic permutations.
    y = jnp.transpose(x_ref[...], (0,) + tuple(p + 1 for p in inner_perm))
    o_ref[...] = y.reshape(o_ref.shape)


def _slice_permute_kernel(x_ref, o_ref, *, perm_sq):
    """Permute one slice (leading output axis tiled away by the grid)."""
    o_ref[...] = jnp.transpose(x_ref[...], perm_sq)


def _whole_array_kernel(x_ref, o_ref, *, perm):
    """Whole-array permutation fallback (small residual cases only)."""
    o_ref[...] = jnp.transpose(x_ref[...], perm)


# ----------------------------------------------------------------------------
# Static tiling helpers (run at trace time, everything here is Python ints)
# ----------------------------------------------------------------------------

def _divisors(n):
    ds = set()
    i = 1
    while i * i <= n:
        if n % i == 0:
            ds.add(i)
            ds.add(n // i)
        i += 1
    return sorted(ds)


def _sublane_multiple(itemsize):
    # f32 -> 8, bf16 -> 16, int8/fp8 -> 32 (packed dtypes pack along sublanes).
    return 8 * max(1, 4 // itemsize)


def _legal_batch_tiles(n, sub):
    """Batch tiles legal as the second-to-last dim of the flat output block."""
    return [d for d in _divisors(n) if d == n or d % sub == 0]


def _vmem_limit(needed_bytes):
    """Explicit scoped-VMEM budget: double-buffered in+out blocks + headroom."""
    return int(min(max(needed_bytes + (2 << 20), 32 << 20), 64 << 20))


def _rotation_split(inner_perm):
    """If inner_perm cyclically moves a leading group of axes to the end,
    return the split point s (the permutation is one (A,B)->(B,A) transpose)."""
    k = len(inner_perm)
    for s in range(1, k):
        if inner_perm == tuple(range(s, k)) + tuple(range(0, s)):
            return s
    return None


def _choose_fast_tiles(n, a, b, itemsize):
    """Pick (bn, tb) for the (n, a, b) -> flat (n, b*a) rotation path."""
    sub = _sublane_multiple(itemsize)
    legal_bn = _legal_batch_tiles(n, sub)
    legal_tb = sorted({d for d in _divisors(b) if d % 128 == 0} | {b})
    per_example = a * b * itemsize

    fitting_bn = [d for d in legal_bn if d * per_example <= _TARGET_BLOCK_BYTES]
    bn = max(fitting_bn) if fitting_bn else min(legal_bn)

    if bn * per_example <= _TARGET_BLOCK_BYTES:
        tb = b
    else:
        fitting_tb = [t for t in legal_tb
                      if bn * a * t * itemsize <= _TARGET_BLOCK_BYTES]
        tb = max(fitting_tb) if fitting_tb else min(legal_tb)

    # v7x megacore: prefer >= 2 grid steps when a legal smaller tile exists.
    if (n // bn) * (b // tb) < 2:
        small_tb = [t for t in legal_tb if t <= b // 2]
        small_bn = [d for d in legal_bn if d <= n // 2]
        if small_tb:
            tb = max(small_tb)
        elif small_bn:
            bn = max(small_bn)
    return bn, tb


def _choose_batch_tile(n, per_example_elems, itemsize):
    """Pick bn for the general (non-rotation) batched path."""
    sub = _sublane_multiple(itemsize)
    legal = _legal_batch_tiles(n, sub)
    fitting = [d for d in legal
               if d * per_example_elems * itemsize <= _TARGET_BLOCK_BYTES]
    bn = max(fitting) if fitting else min(legal)
    if n // bn < 2:  # v7x megacore
        smaller = [d for d in legal if d <= n // 2]
        if smaller:
            bn = max(smaller)
    return bn


# ----------------------------------------------------------------------------
# Path implementations
# ----------------------------------------------------------------------------

def _batched_flat(x, perm, out_shape):
    """perm[0] == 0: per-example permutation with lane-dense flat output."""
    n = x.shape[0]
    in_inner = x.shape[1:]
    inner_perm = tuple(p - 1 for p in perm[1:])
    k = len(inner_perm)
    flat = math.prod(in_inner)
    itemsize = jnp.dtype(x.dtype).itemsize
    cost = pl.CostEstimate(flops=0, transcendentals=0,
                           bytes_accessed=2 * x.size * itemsize)

    s = _rotation_split(inner_perm)
    if s is not None:
        # The inner permutation is a single (A, B) -> (B, A) 2-D transpose.
        a = math.prod(in_inner[:s])
        b = math.prod(in_inner[s:])
        bn, tb = _choose_fast_tiles(n, a, b, itemsize)
        block_bytes = bn * a * tb * itemsize
        xr = x.reshape(n, a, b)                  # free: contiguous view
        out_flat = pl.pallas_call(
            _rot_flat_kernel,
            out_shape=jax.ShapeDtypeStruct((n, flat), x.dtype),
            grid=(n // bn, b // tb),
            in_specs=[pl.BlockSpec((bn, a, tb), lambda i, j: (i, 0, j))],
            out_specs=pl.BlockSpec((bn, tb * a), lambda i, j: (i, j)),
            compiler_params=pltpu.CompilerParams(
                dimension_semantics=("parallel", "parallel"),
                vmem_limit_bytes=_vmem_limit(4 * block_bytes)),
            cost_estimate=cost,
        )(xr)
    else:
        bn = _choose_batch_tile(n, flat, itemsize)
        block_bytes = bn * flat * itemsize
        kernel = functools.partial(_general_flat_kernel, inner_perm=inner_perm)
        out_flat = pl.pallas_call(
            kernel,
            out_shape=jax.ShapeDtypeStruct((n, flat), x.dtype),
            grid=(n // bn,),
            in_specs=[pl.BlockSpec((bn,) + in_inner,
                                   lambda i: (i,) + (0,) * k)],
            out_specs=pl.BlockSpec((bn, flat), lambda i: (i, 0)),
            compiler_params=pltpu.CompilerParams(
                dimension_semantics=("parallel",),
                vmem_limit_bytes=_vmem_limit(4 * block_bytes)),
            cost_estimate=cost,
        )(x)

    # Metadata-only reshape back to the logical permuted shape.
    return out_flat.reshape(out_shape)


def _moved_axis0(x, perm, out_shape):
    """perm[0] != 0: tile over the leading output axis when layout-legal."""
    ndim = x.ndim
    p0 = perm[0]
    itemsize = jnp.dtype(x.dtype).itemsize
    cost = pl.CostEstimate(flops=0, transcendentals=0,
                           bytes_accessed=2 * x.size * itemsize)

    if ndim >= 3 and p0 <= ndim - 3:
        # One output slice per grid step; trailing block dims stay full on both
        # sides, so the (sublane, 128) block constraint is trivially satisfied
        # and the grid pipelines DMA across slices.
        rem = tuple(ax for ax in range(ndim) if ax != p0)
        perm_sq = tuple(rem.index(t) for t in perm[1:])
        in_block = tuple(None if ax == p0 else x.shape[ax] for ax in range(ndim))
        out_block = (None,) + out_shape[1:]
        slice_bytes = (x.size // x.shape[p0]) * itemsize

        def in_idx(i):
            return tuple(i if ax == p0 else 0 for ax in range(ndim))

        def out_idx(i):
            return (i,) + (0,) * (ndim - 1)

        kernel = functools.partial(_slice_permute_kernel, perm_sq=perm_sq)
        return pl.pallas_call(
            kernel,
            out_shape=jax.ShapeDtypeStruct(out_shape, x.dtype),
            grid=(x.shape[p0],),
            in_specs=[pl.BlockSpec(in_block, in_idx)],
            out_specs=pl.BlockSpec(out_block, out_idx),
            compiler_params=pltpu.CompilerParams(
                dimension_semantics=("parallel",),
                vmem_limit_bytes=_vmem_limit(4 * slice_bytes)),
            cost_estimate=cost,
        )(x)

    # TODO(synk): tile the residual cases (rank-2 transpose / leading output
    # axis drawn from one of the last two input dims); a single whole-array
    # block only fits VMEM for modest inputs.
    nbytes = x.size * itemsize
    kernel = functools.partial(_whole_array_kernel, perm=perm)
    return pl.pallas_call(
        kernel,
        out_shape=jax.ShapeDtypeStruct(out_shape, x.dtype),
        grid=(1,),
        in_specs=[pl.BlockSpec(x.shape, lambda i: (0,) * ndim)],
        out_specs=pl.BlockSpec(out_shape, lambda i: (0,) * ndim),
        compiler_params=pltpu.CompilerParams(
            vmem_limit_bytes=_vmem_limit(4 * nbytes)),
        cost_estimate=cost,
    )(x)


@functools.partial(jax.jit, static_argnames=("perm",))
def _permute_impl(x, perm):
    ndim = x.ndim
    if perm == tuple(range(ndim)):
        return x  # identity permutation
    out_shape = tuple(x.shape[p] for p in perm)
    if ndim >= 3 and perm[0] == 0:
        return _batched_flat(x, perm, out_shape)
    return _moved_axis0(x, perm, out_shape)


# ----------------------------------------------------------------------------
# Module
# ----------------------------------------------------------------------------

class Permute:
    """JAX/Pallas equivalent of the torch `Permute` module."""

    def __init__(self, *perm):
        self.perm = tuple(int(p) for p in perm)
        assert sorted(self.perm) == list(range(len(self.perm))), \
            "perm must be a permutation of range(rank)"

    def __call__(self, x):
        assert len(self.perm) == x.ndim, "perm rank must match input rank"
        return _permute_impl(x, perm=self.perm)


# ----------------------------------------------------------------------------
# Demo / self-check
# ----------------------------------------------------------------------------

if __name__ == "__main__":
    key = jax.random.PRNGKey(0)
    # Small NCHW input, consistent with typical conv-feature-map usage.
    x = jax.random.normal(key, (2, 4, 16, 16), dtype=jnp.float32)

    # NCHW -> NHWC, the most common use of Permute around conv layers.
    permute = Permute(0, 2, 3, 1)
    y = jax.block_until_ready(permute(x))

    ref = jnp.transpose(x, (0, 2, 3, 1))
    assert y.shape == ref.shape, (y.shape, ref.shape)
    assert jnp.array_equal(y, ref), "Pallas permute mismatch vs reference"

    # Inverse permutation (NHWC -> NCHW) through the same batched path.
    permute_inv = Permute(0, 3, 1, 2)
    z = jax.block_until_ready(permute_inv(y))
    assert jnp.array_equal(z, x), "Pallas inverse permute mismatch vs reference"

    print("KERNEL_OK")
</pallas_src>

<mosaic_0001>
module attributes {stable_mosaic.version = 11 : i64} {
  func.func @_rot_flat_kernel(%arg0: i32, %arg1: i32, %arg2: memref<2x4x128xf32, #tpu.memory_space<vmem>>, %arg3: memref<2x512xf32, #tpu.memory_space<vmem>>) attributes {dimension_semantics = [#tpu.dimension_semantics<parallel>, #tpu.dimension_semantics<parallel>], iteration_bounds = array<i64: 1, 2>, scalar_prefetch = 0 : i64, scratch_operands = 0 : i64, tpu.core_type = #tpu.core_type<tc>, window_params = [{transform_indices = @transform_0, window_bounds = array<i64: 2, 4, 128>}, {transform_indices = @transform_1, window_bounds = array<i64: 2, 512>}]} {
    %c0 = arith.constant 0 : index
    %c0_0 = arith.constant 0 : index
    %c0_1 = arith.constant 0 : index
    %0 = vector.load %arg2[%c0, %c0_0, %c0_1] : memref<2x4x128xf32, #tpu.memory_space<vmem>>, vector<2x4x128xf32>
    %1 = tpu.transpose %0, [0, 2, 1] : vector<2x4x128xf32> -> vector<2x128x4xf32>
    %2 = vector.shape_cast %1 : vector<2x128x4xf32> to vector<2x512xf32>
    %c0_2 = arith.constant 0 : index
    %c0_3 = arith.constant 0 : index
    %3 = vector.load %arg3[%c0_2, %c0_3] : memref<2x512xf32, #tpu.memory_space<vmem>>, vector<2x512xf32>
    tpu.vector_store %arg3[%c0_2, %c0_3], %2 {strides = array<i32>} : memref<2x512xf32, #tpu.memory_space<vmem>>, vector<2x512xf32>,
    return
  }
  func.func @transform_0(%arg0: i32, %arg1: i32) -> (i32, i32, i32) {
    %c0_i32 = arith.constant 0 : i32
    %c0_i32_0 = arith.constant 0 : i32
    return %arg0, %c0_i32, %arg1 : i32, i32, i32
  }
  func.func @transform_1(%arg0: i32, %arg1: i32) -> (i32, i32) {
    %c0_i32 = arith.constant 0 : i32
    return %arg0, %arg1 : i32, i32
  }
}

</mosaic_0001>

<bundles_post_ra>
// kernel: _permute_impl.1
= control target key start
LH: loop header
LB: loop body
LE: loop exit
PB: predicated region body
PF: predicated region fallthrough
CT: control target
= control target key end

     0   :  { %s2246_s6 = smov 0   ;;  %s2248_s7 = smov 0   ;;  %s3216_s0 = inlined_call_operand.vmem [shape: f32[2,4,256], index: 0, kind: input, shape index: {}]   ;;  %s3217_s1 = inlined_call_operand.vmem [shape: f32[2,1024], index: 1, kind: output, shape index: {}]  }
   0x1   :  { %s2250_s8 = smov 0   ;;  %s2252_s9 = smov 0  }
   0x2   :  { %s2254_s10 = smov 0  }
   0x3 LB: > { %s20_s11 = sadd.s32 1, %s2196_s9  ;;  %p39_p1 = scmp.ne.s32.totalorder %s2188_s7, %s2184_s6  ;;  %s2200_s10 = sphi %s2254_s10, %s11_s10   ;;  %s2196_s9 = sphi %s2252_s9, %s3345_s9   ;;  %s2192_s8 = sphi %s2250_s8, %s3344_s8   ;;  %s2188_s7 = sphi %s2248_s7, %s3343_s7   ;;  %s2184_s6 = sphi %s2246_s6, %s3342_s6  }
   0x4   : > { %p21_p0 = scmp.ge.s32.totalorder %s20_s11, 2  ;;  %p40_p2 = scmp.eq.s32.totalorder %s2200_s10, 0 }
   0x5   : > { %s32_s13 = sadd.s32 1, %s2188_s7  ;;  %p2079_p5 = scmp.ge.s32.totalorder %s2200_s10, 2 }
   0x6   : > { %s3347_s11 = smov (%p21_p0, %s20_s11), 0  ;;  %p41_p3 = por %p40_p2, %p39_p1 }
   0x7   : > { %s28_s12 = ssub.s32 %s2196_s9, %s3347_s11  ;;  %93 = sbr.rel (%p2079_p5) target bundleno = 21 (0x15), region = 16 }
   0x8   : > { %p30_p4 = scmp.eq.s32.totalorder %s28_s12, 0 }
   0xa   : > { %s2281_s14 = scalar_select %p30_p4, %s2188_s7, %s32_s13  }
   0xe   : > { %96 = sbr.rel (!%p41_p3) target bundleno = 21 (0x15), region = 20  ;;  %s98_s15 = sand.u32 (%p41_p3), 1, %s2188_s7  }
   0xf   : > { %s2081_s16 = sshll.u32 (%p41_p3), %s2196_s9, 2  ;;  %s2080_s17 = sshll.u32 (%p41_p3), %s98_s15, 3 }
  0x10   : > { %s105_s20 = scalar_lea.vmem (%p41_p3), %s3216_s0, %s2081_s16  ;;  %s100_s21 = scalar_lea.vmem (%p41_p3), [#allocation2], %s2080_s17 }
  0x11   : > { %v121_v0 = vld [vmem:[%s105_s20] sm:$0xf] (%p41_p3)  ;;  %v123_v1 = vld [vmem:[%s105_s20 + $0x8] sm:$0xf] (%p41_p3) }
  0x12   : > { %122 = vst [vmem:[%s100_s21] sm:$0xf] (%p41_p3), %v121_v0  ;;  %124 = vst [vmem:[%s100_s21 + $0x4] sm:$0xf] (%p41_p3), %v123_v1 }
  0x15 PF: > { %p2082_p6 = scmp.ge.s32.totalorder %s2200_s10, 1  ;;  %p150_p7 = scmp.lt.s32.totalorder %s2200_s10, 3 }
  0x17   : > { %p151_p8 = pnand %p2082_p6, %p150_p7 }
  0x19   : > { %154 = sbr.rel (%p151_p8) target bundleno = 682 (0x2aa), region = 61 }
  0x20   : > { %s157_s22 = sand.u32 1, %s2184_s6   ;;  %v2202_v18 = vmov 1983009808   ;;  %v261_v20 = vlaneseq  ;;  %v2203_v24 = vmov 1934713408   ;;  %v3246_v36 = vmov 0.0  }
  0x21   : > { %s2083_s23 = sshll.u32 %s157_s22, 3  ;;  %v259_v19 = vunpack.c.l.s4 %v2202_v18  ;;  %v290_v25 = vunpack.c.l.s4 %v2203_v24  ;;  %s3237_s25 = smov 8   ;;  %vm1809_vm0 = vcmask 31744   ;;  %vm1811_vm1 = vcmask 64512  }
  0x22   : > { %s159_s24 = scalar_lea.vmem [#allocation2], %s2083_s23  ;;  %v262_v23 = vshrl.u32 %v261_v20, 7  ;;  %s2206_s26 = smov 4   ;;  %vm1813_vm2 = vcmask 97280   ;;  %vm1815_vm3 = vcmask 130048   ;;  %vm1817_vm4 = vcmask 162816  }
  0x23   : > { %v191_v2 = vld [vmem:[%s159_s24] sm:$0xf]  ;;  %v192_v3 = vld [vmem:[%s159_s24 + $0x4] sm:$0xf]  ;;  %v260_v22 = vunpack.c.0.s8 %v259_v19  ;;  %v291_v28 = vunpack.c.0.s8 %v290_v25  ;;  %s3238_s27 = smov 12   ;;  %s3218_s28 = smov 72  }
  0x24   : > { %193 = vxpose.xlu0.b32.start.end [1/1] (short) %v191_v2, 128  ;;  %s2209_s29 = smov 16   ;;  %s2210_s30 = smov 24   ;;  %vm1819_vm5 = vcmask 195584   ;;  %vm1821_vm6 = vcmask 228352   ;;  %vm3252_vm7 = vcmask 261120   ;;  %vm3253_vm8 = vcmask 293888  }
  0x25   : > { %v2322_v27 = vsub.s32 %v260_v22, %v262_v23  ;;  %v2326_v32 = vsub.s32 %v291_v28, %v262_v23  ;;  %s2211_s2 = smov 20   ;;  %s2212_s3 = smov 28   ;;  %vm3254_vm9 = vcmask 326656   ;;  %vm3255_vm10 = vcmask 359424  }
  0x26   : > { %s3236_s4 = smov 52   ;;  %s3242_s5 = smov 32   ;;  %vm3257_vm11 = vcmask 392192   ;;  %vm3256_vm12 = vcmask 424960   ;;  %vm1835_vm13 = vcmask 457728   ;;  %vm3261_vm14 = vcmask 490496  }
  0x27   : > { %3273 = vst [vmem:[#allocation3_spill] sm:$0xff] %v2322_v27  ;;  %s3220_s6 = smov 60   ;;  %s3226_s12 = smov 40   ;;  %vm3258_vm15 = vcmask 523264  }
  0x28   : > { %s3222_s13 = smov 68   ;;  %s2218_s15 = smov 36  }
  0x29   : > { %s3224_s16 = smov 76   ;;  %s2220_s17 = smov 44  }
  0x2a   : > { %s3239_s18 = smov 84   ;;  %s2222_s19 = smov 48  }
  0x2b   : > { %s3241_s20 = smov 92   ;;  %s3228_s21 = smov 56  }
  0x2c   : > { %s3243_s22 = smov 100   ;;  %s3244_s23 = smov 108  }
  0x2d   : > { %s3245_s24 = smov 116  }
  0x61   : > { %225 = vxpose.xlu0.b32.start.end [1/1] (short) %v192_v3, 128 }
  0xa4   : > { %v209_v4 = vpop.trf.xlu0 }
  0xa5   : > { %v264_v30 = vrot.slane %v209_v4, %v2322_v27  ;;  %v257_v40 = vcombine.high %v209_v4, %v3246_v36 }
  0xa7   : > { %v271_v46 = vrot.slane %v257_v40, %v2322_v27 }
  0xa8   : > { %v2292_v5 = vpop.trf.xlu0 }
  0xa9   : > { %v330_v3 = vrot.slane %v2292_v5, %v2322_v27 }
  0xac   : > { %v2294_v6 = vpop.trf.xlu0 }
  0xad   : > { %v2341_v42 = vrot.slane %v2294_v6, %v2322_v27 }
  0xb0   : > { %v2296_v7 = vpop.trf.xlu0 }
  0xb4   : > { %v2298_v8 = vpop.trf.xlu0 }
  0xb8   : > { %v2300_v9 = vpop.trf.xlu0 }
  0xb9   : > { %v587_v55 = vcombine.high %v2300_v9, %v3246_v36 }
  0xbb   : > { %v601_v59 = vrot.slane %v587_v55, %v2322_v27 }
  0xbc   : > { %v2302_v10 = vpop.trf.xlu0 }
  0xbd   : > { %v660_v18 = vrot.slane %v2302_v10, %v2322_v27 }
  0xc0   : > { %v2304_v11 = vpop.trf.xlu0 }
  0xc4   : > { %v2306_v12 = vpop.trf.xlu0 }
  0xc8   : > { %v2308_v13 = vpop.trf.xlu0 }
  0xcc   : > { %v2310_v14 = vpop.trf.xlu0 }
  0xd0   : > { %v2312_v15 = vpop.trf.xlu0 }
  0xd4   : > { %v2314_v16 = vpop.trf.xlu0 }
  0xd8   : > { %v2316_v17 = vpop.trf.xlu0 }
  0xdc   : > { %v2318_v21 = vpop.trf.xlu0 }
  0xe0   : > { %v2320_v26 = vpop.trf.xlu0 }
  0xe4   : > { %v241_v29 = vpop.trf.xlu0 }
  0xe5   : > { %v279_v31 = vrot.slane %v241_v29, %v2322_v27  ;;  %v272_v37 = vcombine.high %v241_v29, %v3246_v36  ;;  %v653_v29 = vcombine.high %v2302_v10, %v3246_v36 }
  0xe7   : > { %v287_v33 = vcombine.low %v264_v30, %v279_v31  ;;  %v288_v34 = vcombine.high %v264_v30, %v279_v31  ;;  %v286_v43 = vrot.slane %v272_v37, %v2322_v27  ;;  %v2404_v31 = vrot.slane %v2306_v12, %v2322_v27 }
  0xe8   : > { %v2328_v35 = vpop.trf.xlu0 }
  0xe9   : > { %v302_v38 = vrot.slane %v288_v34, %v2326_v32  ;;  %v2333_v39 = vrot.slane %v287_v33, %v2326_v32  ;;  %v303_v51 = vcombine.low %v271_v46, %v286_v43  ;;  %v304_v54 = vcombine.high %v271_v46, %v286_v43 }
  0xea   : > { %v345_v62 = vrot.slane %v2328_v35, %v2322_v27  ;;  %v338_v46 = vcombine.high %v2328_v35, %v3246_v36  ;;  %v917_v35 = vcombine.high %v2310_v14, %v3246_v36 }
  0xeb   : > { %1318 = vrot.lane.b32.xlu1 %v302_v38, %s3237_s25  ;;  %v319_v45 = vcombine.high %v2333_v39, %v3246_v36  ;;  %v320_v49 = vcombine.high %v302_v38, %v3246_v36  ;;  %v311_v53 = vrot.slane %v303_v51, %v2326_v32  ;;  %v318_v58 = vrot.slane %v304_v54, %v2326_v32 }
  0xec   : > { %v2337_v41 = vpop.trf.xlu0  ;;  %v353_v20 = vcombine.low %v330_v3, %v345_v62  ;;  %v354_v33 = vcombine.high %v330_v3, %v345_v62 }
  0xed   : > { %v2346_v44 = vrot.slane %v2337_v41, %v2322_v27  ;;  %v321_v0 = vcombine.high %v311_v53, %v3246_v36  ;;  %v322_v22 = vcombine.high %v318_v58, %v3246_v36 }
  0xee   : > { %v361_v37 = vrot.slane %v353_v20, %v2326_v32  ;;  %v983_v20 = vcombine.high %v2312_v15, %v3246_v36 }
  0xef   : > { %v420_v47 = vcombine.high %v2341_v42, %v2346_v44  ;;  %1314 = vrot.lane.b32.xlu1 %v319_v45, %s2206_s26  ;;  %v323_v45 = vcombine.high %v2292_v5, %v3246_v36  ;;  %v368_v5 = vrot.slane %v354_v33, %v2326_v32 }
  0xf0   : > { %v2354_v48 = vpop.trf.xlu0 }
  0xf1   : > { %v2358_v50 = vrot.slane %v420_v47, %v2326_v32 }
  0xf3   : > { %1322 = vrot.lane.b32.xlu1 %v320_v49, %s3238_s27  ;;  %1382 = vrot.lane.b32.xlu0 %v2358_v50, %s3218_s28  ;;  %v667_v49 = vrot.slane %v653_v29, %v2322_v27  ;;  %s2228_s28 = smov 64  }
  0xf4   : > { %v2363_v52 = vpop.trf.xlu0 }
  0xf7   : > { %1326 = vrot.lane.b32.xlu1 %v311_v53, %s2209_s29 }
  0xf8   : > { %v2369_v56 = vpop.trf.xlu0 }
  0xf9   : > { %v602_v57 = vcombine.high %v2369_v56, %v3246_v36 }
  0xfb   : > { %v616_v60 = vrot.slane %v602_v57, %v2322_v27  ;;  %1334 = vrot.lane.b32.xlu1 %v318_v58, %s2210_s30  ;;  %v2440_v58 = vrot.slane %v323_v45, %v2322_v27 }
  0xfc   : > { %v247_v61 = vpop.trf.xlu0 }
  0xfd   : > { %v633_v63 = vcombine.low %v601_v59, %v616_v60  ;;  %v634_v1 = vcombine.high %v601_v59, %v616_v60  ;;  %v675_v2 = vrot.slane %v247_v61, %v2322_v27  ;;  %v668_v23 = vcombine.high %v247_v61, %v3246_v36 }
  0xfe   : > { %v2443_v59 = vrot.slane %v338_v46, %v2322_v27  ;;  %v719_v60 = vcombine.high %v2304_v11, %v3246_v36  ;;  %v2450_v61 = vrot.slane %v2304_v11, %v2322_v27  ;;  %v931_v11 = vrot.slane %v917_v35, %v2322_v27 }
  0xff   : > { %1330 = vrot.lane.b32.xlu1 %v321_v0, %s2211_s2  ;;  %v2385_v4 = vrot.slane %v633_v63, %v2326_v32  ;;  %v683_v24 = vcombine.low %v660_v18, %v675_v2  ;;  %v2394_v28 = vrot.slane %v634_v1, %v2326_v32  ;;  %v682_v38 = vrot.slane %v668_v23, %v2322_v27 }
 0x100   : > { %v248_v19 = vpop.trf.xlu0  ;;  %v684_v40 = vcombine.high %v660_v18, %v675_v2  ;;  %v924_v1 = vrot.slane %v2310_v14, %v2322_v27  ;;  %v385_v18 = vcombine.high %v361_v37, %v3246_v36  ;;  %v369_v29 = vcombine.low %v2440_v58, %v2443_v59 }
 0x101   : > { %v651_v25 = vcombine.high %v2385_v4, %v3246_v36  ;;  %v652_v10 = vcombine.high %v2394_v28, %v3246_v36  ;;  %v2415_v43 = vrot.slane %v683_v24, %v2326_v32  ;;  %v699_v54 = vcombine.low %v667_v49, %v682_v38 }
 0x102   : > { %v2437_v57 = vrot.slane %v684_v40, %v2326_v32  ;;  %v700_v62 = vcombine.high %v667_v49, %v682_v38  ;;  %v2453_v63 = vrot.slane %v248_v19, %v2322_v27  ;;  %v734_v33 = vcombine.high %v248_v19, %v3246_v36 }
 0x103   : > { %1338 = vrot.lane.b32.xlu1 %v322_v22, %s2212_s3  ;;  %1486 = vrot.lane.b32.xlu0 %v651_v25, %s3236_s4  ;;  %v715_v55 = vcombine.high %v2415_v43, %v3246_v36  ;;  %v2467_v23 = vrot.slane %v699_v54, %v2326_v32  ;;  %v386_v40 = vcombine.high %v368_v5, %v3246_v36 }
 0x104   : > { %v2400_v30 = vpop.trf.xlu0  ;;  %v716_v22 = vcombine.high %v2437_v57, %v3246_v36  ;;  %v990_v49 = vrot.slane %v2312_v15, %v2322_v27  ;;  %v748_v15 = vrot.slane %v734_v33, %v2322_v27 }
 0x105   : > { %v2408_v34 = vrot.slane %v2400_v30, %v2322_v27 }
 0x107   : > { %v815_v47 = vcombine.low %v2404_v31, %v2408_v34  ;;  %1342 = vrot.lane.b32.xlu1 %v361_v37, %s3242_s5  ;;  %1494 = vrot.lane.b32.xlu0 %v652_v10, %s3220_s6  ;;  %v749_v37 = vcombine.low %v2450_v61, %v2453_v63  ;;  %v2479_v10 = vrot.slane %v700_v62, %v2326_v32 }
 0x108   : > { %v2426_v51 = vpop.trf.xlu0  ;;  %v377_v62 = vrot.slane %v369_v29, %v2326_v32 }
 0x109   : > { %v2429_v53 = vrot.slane %v815_v47, %v2326_v32 }
 0x10b   : > { %3274 = vst [vmem:[#allocation4_spill] sm:$0xff] %v2429_v53  ;;  %1350 = vrot.lane.b32.xlu1 %v368_v5, %s3226_s12  ;;  %1502 = vrot.lane.b32.xlu0 %v715_v55, %s3222_s13  ;;  %v717_v5 = vcombine.high %v2467_v23, %v3246_v36  ;;  %v997_v55 = vrot.slane %v983_v20, %v2322_v27 }
 0x10c   : > { %v251_v0 = vpop.trf.xlu0  ;;  %v718_v20 = vcombine.high %v2479_v10, %v3246_v36 }
 0x10d   : > { %v932_v2 = vcombine.high %v251_v0, %v3246_v36  ;;  %v939_v3 = vrot.slane %v251_v0, %v2322_v27  ;;  %v370_v0 = vcombine.high %v2440_v58, %v2443_v59  ;;  %v2509_v58 = vrot.slane %v749_v37, %v2326_v32 }
 0x10f   : > { %v946_v24 = vrot.slane %v932_v2, %v2322_v27  ;;  %v947_v14 = vcombine.low %v924_v1, %v939_v3  ;;  %v948_v25 = vcombine.high %v924_v1, %v939_v3  ;;  %1346 = vrot.lane.b32.xlu1 %v385_v18, %s2218_s15  ;;  %1510 = vrot.lane.b32.xlu0 %v716_v22, %s3224_s16 }
 0x110   : > { %v252_v38 = vpop.trf.xlu0  ;;  %v384_v29 = vrot.slane %v370_v0, %v2326_v32  ;;  %v781_v37 = vcombine.high %v2509_v58, %v3246_v36  ;;  %v785_v0 = vcombine.high %v2306_v12, %v3246_v36 }
 0x111   : > { %v2482_v45 = vrot.slane %v947_v14, %v2326_v32  ;;  %v2485_v46 = vrot.slane %v948_v25, %v2326_v32  ;;  %v963_v47 = vcombine.low %v931_v11, %v946_v24  ;;  %v964_v19 = vcombine.high %v931_v11, %v946_v24 }
 0x112   : > { %v998_v35 = vcombine.high %v252_v38, %v3246_v36  ;;  %v1005_v54 = vrot.slane %v252_v38, %v2322_v27  ;;  %v750_v11 = vcombine.high %v2450_v61, %v2453_v63  ;;  %v733_v61 = vrot.slane %v719_v60, %v2322_v27 }
 0x113   : > { %1354 = vrot.lane.b32.xlu1 %v386_v40, %s2220_s17  ;;  %v2499_v1 = vrot.slane %v963_v47, %v2326_v32  ;;  %1518 = vrot.lane.b32.xlu0 %v717_v5, %s3239_s18  ;;  %v2512_v59 = vrot.slane %v964_v19, %v2326_v32  ;;  %v387_v60 = vcombine.high %v377_v62, %v3246_v36 }
 0x114   : > { %v1012_v2 = vrot.slane %v998_v35, %v2322_v27  ;;  %v1013_v3 = vcombine.low %v990_v49, %v1005_v54  ;;  %v1014_v18 = vcombine.high %v990_v49, %v1005_v54  ;;  %v765_v33 = vcombine.low %v733_v61, %v748_v15 }
 0x115   : > { %v2530_v38 = vrot.slane %v750_v11, %v2326_v32  ;;  %v766_v47 = vcombine.high %v733_v61, %v748_v15  ;;  %v419_v35 = vcombine.low %v2341_v42, %v2346_v44  ;;  %v388_v54 = vcombine.high %v384_v29, %v3246_v36 }
 0x116   : > { %v2515_v22 = vrot.slane %v1013_v3, %v2326_v32  ;;  %v2518_v24 = vrot.slane %v1014_v18, %v2326_v32  ;;  %v1029_v14 = vcombine.low %v997_v55, %v1012_v2  ;;  %v1030_v25 = vcombine.high %v997_v55, %v1012_v2 }
 0x117   : > { %1358 = vrot.lane.b32.xlu1 %v377_v62, %s2222_s19  ;;  %1526 = vrot.lane.b32.xlu0 %v718_v20, %s3241_s20  ;;  %v782_v19 = vcombine.high %v2530_v38, %v3246_v36  ;;  %v2541_v49 = vrot.slane %v765_v33, %v2326_v32  ;;  %v800_v5 = vcombine.high %v2400_v30, %v3246_v36 }
 0x118   : > { %v2524_v63 = vrot.slane %v1029_v14, %v2326_v32  ;;  %v2533_v40 = vrot.slane %v1030_v25, %v2326_v32  ;;  %v2553_v62 = vrot.slane %v766_v47, %v2326_v32  ;;  %v404_v42 = vcombine.high %v2337_v41, %v3246_v36 }
 0x119   : > { %v783_v55 = vcombine.high %v2541_v49, %v3246_v36  ;;  %v427_v44 = vrot.slane %v419_v35, %v2326_v32  ;;  %v814_v30 = vrot.slane %v800_v5, %v2322_v27  ;;  %v816_v15 = vcombine.high %v2404_v31, %v2408_v34 }
 0x11a   : > { %3275 = vst [vmem:[#allocation5_spill] sm:$0xff] %v2533_v40  ;;  %v784_v2 = vcombine.high %v2553_v62, %v3246_v36  ;;  %v389_v3 = vcombine.high %v2294_v6, %v3246_v36  ;;  %v799_v12 = vrot.slane %v785_v0, %v2322_v27  ;;  %v418_v41 = vrot.slane %v404_v42, %v2322_v27 }
 0x11b   : > { %1366 = vrot.lane.b32.xlu1 %v384_v29, %s3228_s21  ;;  %1534 = vrot.lane.b32.xlu0 %v781_v37, %s3243_s22  ;;  %v451_v18 = vcombine.high %v427_v44, %v3246_v36  ;;  %v2575_v31 = vrot.slane %v816_v15, %v2326_v32  ;;  %v452_v6 = vcombine.high %v2358_v50, %v3246_v36 }
 0x11c   : > { %v831_v34 = vcombine.low %v799_v12, %v814_v30  ;;  %v403_v11 = vrot.slane %v389_v3, %v2322_v27  ;;  %v873_v14 = vrot.slane %v2426_v51, %v2322_v27  ;;  %v832_v61 = vcombine.high %v799_v12, %v814_v30 }
 0x11d   : > { %v858_v29 = vrot.slane %v2308_v13, %v2322_v27  ;;  %v866_v50 = vcombine.high %v2426_v51, %v3246_v36  ;;  %v1056_v3 = vrot.slane %v2314_v16, %v2322_v27 }
 0x11e   : > { %v435_v20 = vcombine.low %v403_v11, %v418_v41  ;;  %v2586_v25 = vrot.slane %v831_v34, %v2326_v32  ;;  %v436_v37 = vcombine.high %v403_v11, %v418_v41  ;;  %v2597_v47 = vrot.slane %v832_v61, %v2326_v32 }
 0x11f   : > { %1362 = vrot.lane.b32.xlu1 %v387_v60, %s3236_s4  ;;  %1542 = vrot.lane.b32.xlu0 %v782_v19, %s3244_s23  ;;  %v881_v60 = vcombine.low %v858_v29, %v873_v14  ;;  %v851_v19 = vcombine.high %v2308_v13, %v3246_v36  ;;  %v882_v5 = vcombine.high %v858_v29, %v873_v14 }
 0x120   : > { %v443_v33 = vrot.slane %v435_v20, %v2326_v32  ;;  %v450_v35 = vrot.slane %v436_v37, %v2326_v32  ;;  %v477_v13 = vrot.slane %v2354_v48, %v2322_v27  ;;  %v1049_v20 = vcombine.high %v2314_v16, %v3246_v36 }
 0x121   : > { %v2607_v51 = vrot.slane %v881_v60, %v2326_v32  ;;  %v865_v0 = vrot.slane %v851_v19, %v2322_v27  ;;  %v2618_v15 = vrot.slane %v882_v5, %v2326_v32  ;;  %v470_v16 = vcombine.high %v2354_v48, %v3246_v36 }
 0x122   : > { %v453_v42 = vcombine.high %v443_v33, %v3246_v36  ;;  %v454_v41 = vcombine.high %v450_v35, %v3246_v36 }
 0x123   : > { %1370 = vrot.lane.b32.xlu1 %v388_v54, %s3220_s6  ;;  %1550 = vrot.lane.b32.xlu0 %v783_v55, %s3245_s24  ;;  %s3234_s6 = smov 124   ;;  %v880_v54 = vrot.slane %v866_v50, %v2322_v27  ;;  %v253_v55 = vpop.trf.xlu0  ;;  %v1063_v50 = vrot.slane %v1049_v20, %v2322_v27  ;;  %v484_v48 = vrot.slane %v470_v16, %v2322_v27 }
 0x124   : > { %v1071_v30 = vrot.slane %v253_v55, %v2322_v27  ;;  %v1064_v34 = vcombine.high %v253_v55, %v3246_v36  ;;  %v455_v55 = vcombine.high %v2296_v7, %v3246_v36 }
 0x126   : > { %v1079_v11 = vcombine.low %v1056_v3, %v1071_v30  ;;  %v1078_v61 = vrot.slane %v1064_v34, %v2322_v27  ;;  %v1080_v29 = vcombine.high %v1056_v3, %v1071_v30  ;;  %v1122_v3 = vrot.slane %v2316_v17, %v2322_v27 }
 0x127   : > { %1374 = vrot.lane.b32.xlu1 %v427_v44, %s2228_s28  ;;  %1558 = vrot.lane.b32.xlu0 %v784_v2, %s3234_s6  ;;  %v897_v44 = vcombine.low %v865_v0, %v880_v54  ;;  %v462_v2 = vrot.slane %v2296_v7, %v2322_v27  ;;  %v469_v7 = vrot.slane %v455_v55, %v2322_v27 }
 0x129   : > { %v485_v12 = vcombine.low %v462_v2, %v477_v13  ;;  %v486_v60 = vcombine.high %v462_v2, %v477_v13 }
 0x12b   : > { %1378 = vrot.lane.b32.xlu1 %v451_v18, %s3222_s13  ;;  %1566 = vrot.lane.b32.xlu0 %v2575_v31, %s3237_s25  ;;  %s2230_s13 = smov 80   ;;  %v898_v18 = vcombine.high %v865_v0, %v880_v54  ;;  %v493_v14 = vrot.slane %v485_v12, %v2326_v32  ;;  %v1095_v54 = vcombine.low %v1063_v50, %v1078_v61  ;;  %v254_v0 = vpop.trf.xlu0 }
 0x12c   : > { %v500_v13 = vrot.slane %v486_v60, %v2326_v32  ;;  %v1137_v30 = vrot.slane %v254_v0, %v2322_v27  ;;  %v1130_v34 = vcombine.high %v254_v0, %v3246_v36 }
 0x12d   : > { %v2643_v37 = vrot.slane %v898_v18, %v2326_v32  ;;  %v517_v19 = vcombine.high %v493_v14, %v3246_v36 }
 0x12e   : > { %v518_v12 = vcombine.high %v500_v13, %v3246_v36 }
 0x12f   : > { %1386 = vrot.lane.b32.xlu1 %v452_v6, %s3224_s16  ;;  %1574 = vrot.lane.b32.xlu0 %v2586_v25, %s2209_s29  ;;  %s2231_s16 = smov 88   ;;  %v2630_v6 = vrot.slane %v897_v44, %v2326_v32  ;;  %v2664_v44 = vrot.slane %v1095_v54, %v2326_v32 }
 0x131   : > { %v1113_v20 = vcombine.high %v2664_v44, %v3246_v36 }
 0x133   : > { %1390 = vrot.lane.b32.xlu1 %v443_v33, %s2230_s13  ;;  %1582 = vrot.lane.b32.xlu0 %v2597_v47, %s2210_s30  ;;  %v2640_v33 = vrot.slane %v1079_v11, %v2326_v32  ;;  %v1145_v11 = vcombine.low %v1122_v3, %v1137_v30 }
 0x135   : > { %3276 = vst [vmem:[#allocation6_spill] sm:$0xff] %v2640_v33  ;;  %v1111_v5 = vcombine.high %v2640_v33, %v3246_v36  ;;  %v2688_v16 = vrot.slane %v1145_v11, %v2326_v32 }
 0x137   : > { %1398 = vrot.lane.b32.xlu1 %v450_v35, %s2231_s16  ;;  %1590 = vrot.lane.b32.xlu0 %v2607_v51, %s3242_s5  ;;  %v2653_v35 = vrot.slane %v1080_v29, %v2326_v32  ;;  %v1144_v29 = vrot.slane %v1130_v34, %v2322_v27 }
 0x139   : > { %v1112_v2 = vcombine.high %v2653_v35, %v3246_v36 }
 0x13b   : > { %1394 = vrot.lane.b32.xlu1 %v453_v42, %s3239_s18  ;;  %1598 = vrot.lane.b32.xlu0 %v2618_v15, %s3226_s12  ;;  %s2232_s12 = smov 96   ;;  %v1096_v42 = vcombine.high %v1063_v50, %v1078_v61  ;;  %v1146_v50 = vcombine.high %v1122_v3, %v1137_v30 }
 0x13d   : > { %v2676_v18 = vrot.slane %v1096_v42, %v2326_v32  ;;  %v2699_v55 = vrot.slane %v1146_v50, %v2326_v32  ;;  %v528_v42 = vrot.slane %v2298_v8, %v2322_v27  ;;  %v536_v50 = vcombine.high %v2363_v52, %v3246_v36 }
 0x13f   : > { %1402 = vrot.lane.b32.xlu1 %v454_v41, %s3241_s20  ;;  %1606 = vrot.lane.b32.xlu0 %v2630_v6, %s2222_s19  ;;  %v501_v41 = vcombine.low %v469_v7, %v484_v48  ;;  %v1114_v60 = vcombine.high %v2676_v18, %v3246_v36 }
 0x141   : > { %v509_v61 = vrot.slane %v501_v41, %v2326_v32 }
 0x143   : > { %1406 = vrot.lane.b32.xlu1 %v493_v14, %s2232_s12  ;;  %1614 = vrot.lane.b32.xlu0 %v2643_v37, %s3228_s21  ;;  %s3230_s21 = smov 104   ;;  %v1115_v14 = vcombine.high %v2316_v17, %v3246_v36  ;;  %v543_v17 = vrot.slane %v2363_v52, %v2322_v27  ;;  %v519_v54 = vcombine.high %v509_v61, %v3246_v36 }
 0x145   : > { %v551_v30 = vcombine.low %v528_v42, %v543_v17 }
 0x147   : > { %1410 = vrot.lane.b32.xlu1 %v517_v19, %s3243_s22  ;;  %1686 = vrot.lane.b32.xlu0 %v1111_v5, %s2206_s26  ;;  %v1129_v19 = vrot.slane %v1115_v14, %v2322_v27  ;;  %v502_v5 = vcombine.high %v469_v7, %v484_v48  ;;  %v1178_v7 = vcombine.high %v2699_v55, %v3246_v36 }
 0x148   : > { %v2719_v11 = vrot.slane %v551_v30, %v2326_v32  ;;  %v550_v30 = vrot.slane %v536_v50, %v2322_v27 }
 0x149   : > { %v1161_v0 = vcombine.low %v1129_v19, %v1144_v29  ;;  %v1162_v3 = vcombine.high %v1129_v19, %v1144_v29  ;;  %v1188_v29 = vrot.slane %v2318_v21, %v2322_v27 }
 0x14b   : > { %1414 = vrot.lane.b32.xlu1 %v500_v13, %s3230_s21  ;;  %1694 = vrot.lane.b32.xlu0 %v1112_v2, %s3238_s27  ;;  %s3232_s21 = smov 112   ;;  %v1177_v13 = vcombine.high %v2688_v16, %v3246_v36  ;;  %v516_v2 = vrot.slane %v502_v5, %v2326_v32  ;;  %v2709_v48 = vrot.slane %v1161_v0, %v2326_v32 }
 0x14d   : > { %v520_v34 = vcombine.high %v516_v2, %v3246_v36 }
 0x14f   : > { %1418 = vrot.lane.b32.xlu1 %v518_v12, %s3244_s23  ;;  %1702 = vrot.lane.b32.xlu0 %v1113_v20, %s2211_s2  ;;  %v255_v12 = vpop.trf.xlu0  ;;  %v2722_v20 = vrot.slane %v1162_v3, %v2326_v32 }
 0x150   : > { %v1203_v14 = vrot.slane %v255_v12, %v2322_v27 }
 0x151   : > { %v1180_v0 = vcombine.high %v2722_v20, %v3246_v36 }
 0x152   : > { %v1211_v5 = vcombine.low %v1188_v29, %v1203_v14 }
 0x153   : > { %1422 = vrot.lane.b32.xlu1 %v509_v61, %s3232_s21  ;;  %1710 = vrot.lane.b32.xlu0 %v1114_v60, %s2212_s3  ;;  %s2235_s21 = smov 120   ;;  %v1179_v61 = vcombine.high %v2709_v48, %v3246_v36  ;;  %v552_v60 = vcombine.high %v528_v42, %v543_v17 }
 0x154   : > { %v1219_v42 = vrot.slane %v1211_v5, %v2326_v32 }
 0x155   : > { %v566_v17 = vrot.slane %v552_v60, %v2326_v32  ;;  %v1181_v60 = vcombine.high %v2318_v21, %v3246_v36 }
 0x156   : > { %v1243_v50 = vcombine.high %v1219_v42, %v3246_v36 }
 0x157   : > { %1426 = vrot.lane.b32.xlu1 %v519_v54, %s3245_s24  ;;  %1718 = vrot.lane.b32.xlu0 %v1177_v13, %s2218_s15  ;;  %v583_v54 = vcombine.high %v2719_v11, %v3246_v36  ;;  %v521_v13 = vcombine.high %v2298_v8, %v3246_v36  ;;  %v584_v8 = vcombine.high %v566_v17, %v3246_v36 }
 0x15b   : > { %1430 = vrot.lane.b32.xlu1 %v516_v2, %s2235_s21  ;;  %1726 = vrot.lane.b32.xlu0 %v1178_v7, %s2220_s17  ;;  %v535_v2 = vrot.slane %v521_v13, %v2322_v27 }
 0x15d   : > { %v2715_v41 = vpop.permute.xlu1 %1318  ;;  %v567_v7 = vcombine.low %v535_v2, %v550_v30 }
 0x15f   : > { %1434 = vrot.lane.b32.xlu1 %v520_v34, %s3234_s6  ;;  %1734 = vrot.lane.b32.xlu0 %v1179_v61, %s3236_s4  ;;  %s3277_s6 = smov 60   ;;  %v1196_v34 = vcombine.high %v255_v12, %v3246_v36  ;;  %v1212_v61 = vcombine.high %v1188_v29, %v1203_v14  ;;  %s3278_s4 = smov 68   ;;  %v575_v5 = vrot.slane %v567_v7, %v2326_v32 }
 0x160   : > { %v1195_v12 = vrot.slane %v1181_v60, %v2322_v27  ;;  %v568_v29 = vcombine.high %v535_v2, %v550_v30 }
 0x161   : > { %v2733_v19 = vpop.permute.xlu1 %1314  ;;  %v1226_v13 = vrot.slane %v1212_v61, %v2326_v32  ;;  %v585_v21 = vcombine.high %v575_v5, %v3246_v36 }
 0x163   : > { %1438 = vrot.lane.b32.xlu1 %v583_v54, %s2206_s26  ;;  %1742 = vrot.lane.b32.xlu0 %v1180_v0, %s3277_s6  ;;  %v1210_v0 = vrot.slane %v1196_v34, %v2322_v27  ;;  %v582_v34 = vrot.slane %v568_v29, %v2326_v32 }
 0x165   : > { %v2744_v52 = vpop.permute.xlu1 %1322  ;;  %v586_v60 = vcombine.high %v582_v34, %v3246_v36 }
 0x167   : > { %1442 = vrot.lane.b32.xlu1 %v566_v17, %s3237_s25  ;;  %1746 = vrot.lane.b32.xlu0 %v1219_v42, %s2228_s28  ;;  %s3279_s25 = smov 72   ;;  %v1227_v17 = vcombine.low %v1195_v12, %v1210_v0  ;;  %v1244_v42 = vcombine.high %v1226_v13, %v3246_v36 }
 0x169   : > { %v2751_v3 = vpop.permute.xlu1 %1326  ;;  %v1235_v61 = vrot.slane %v1227_v17, %v2326_v32 }
 0x16b   : > { %1446 = vrot.lane.b32.xlu1 %v584_v8, %s3238_s27  ;;  %1750 = vrot.lane.b32.xlu0 %v1243_v50, %s3278_s4  ;;  %s3280_s27 = smov 76   ;;  %v609_v8 = vrot.slane %v2369_v56, %v2322_v27  ;;  %v594_v50 = vrot.slane %v2300_v9, %v2322_v27  ;;  %v1245_v56 = vcombine.high %v1235_v61, %v3246_v36 }
 0x16d   : > { %v2760_v54 = vpop.permute.xlu1 %1334  ;;  %v617_v30 = vcombine.low %v594_v50, %v609_v8 }
 0x16f   : > { %1450 = vrot.lane.b32.xlu1 %v575_v5, %s2209_s29  ;;  %1754 = vrot.lane.b32.xlu0 %v1226_v13, %s3279_s25  ;;  %v1228_v5 = vcombine.high %v1195_v12, %v1210_v0  ;;  %v256_v13 = vpop.trf.xlu0  ;;  %v625_v9 = vrot.slane %v617_v30, %v2326_v32  ;;  %v1254_v0 = vrot.slane %v2320_v26, %v2322_v27 }
 0x170   : > { %v1269_v29 = vrot.slane %v256_v13, %v2322_v27  ;;  %v618_v12 = vcombine.high %v594_v50, %v609_v8 }
 0x171   : > { %v2768_v14 = vpop.permute.xlu1 %1330  ;;  %v1242_v17 = vrot.slane %v1228_v5, %v2326_v32 }
 0x172   : > { %v632_v5 = vrot.slane %v618_v12, %v2326_v32  ;;  %v1247_v12 = vcombine.high %v2320_v26, %v3246_v36 }
 0x173   : > { %1454 = vrot.lane.b32.xlu1 %v585_v21, %s2211_s2  ;;  %1758 = vrot.lane.b32.xlu0 %v1244_v42, %s3280_s27 }
 0x174   : > { %v650_v50 = vcombine.high %v632_v5, %v3246_v36 }
 0x175   : > { %v2776_v7 = vpop.permute.xlu1 %1338 }
 0x177   : > { %1458 = vrot.lane.b32.xlu1 %v582_v34, %s2210_s30  ;;  %1762 = vrot.lane.b32.xlu0 %v1235_v61, %s2230_s13  ;;  %v649_v34 = vcombine.high %v625_v9, %v3246_v36  ;;  %v1277_v61 = vcombine.low %v1254_v0, %v1269_v29 }
 0x179   : > { %v2784_v2 = vpop.permute.xlu1 %1342 }
 0x17b   : > { %1462 = vrot.lane.b32.xlu1 %v586_v60, %s2212_s3  ;;  %1766 = vrot.lane.b32.xlu0 %v1245_v56, %s3239_s18  ;;  %v1246_v60 = vcombine.high %v1242_v17, %v3246_v36  ;;  %v1285_v56 = vrot.slane %v1277_v61, %v2326_v32  ;;  %s3281_s18 = smov 40  }
 0x17d   : > { %v2790_v21 = vpop.permute.xlu1 %1350 }
 0x17f   : > { %1466 = vrot.lane.b32.xlu1 %v625_v9, %s3242_s5  ;;  %1770 = vrot.lane.b32.xlu0 %v1242_v17, %s2231_s16  ;;  %v1262_v9 = vcombine.high %v256_v13, %v3246_v36  ;;  %v1278_v17 = vcombine.high %v1254_v0, %v1269_v29  ;;  %v1261_v13 = vrot.slane %v1247_v12, %v2322_v27  ;;  %s3283_s5 = smov 56  }
 0x181   : > { %v2799_v42 = vpop.permute.xlu1 %1346  ;;  %v1292_v33 = vrot.slane %v1278_v17, %v2326_v32 }
 0x183   : > { %1470 = vrot.lane.b32.xlu1 %v649_v34, %s2218_s15  ;;  %1774 = vrot.lane.b32.xlu0 %v1246_v60, %s3241_s20  ;;  %v1309_v34 = vcombine.high %v1285_v56, %v3246_v36  ;;  %v1276_v60 = vrot.slane %v1262_v9, %v2322_v27  ;;  %s3282_s20 = smov 104   ;;  %v1310_v26 = vcombine.high %v1292_v33, %v3246_v36 }
 0x185   : > { %v2805_v30 = vpop.permute.xlu1 %1354  ;;  %v1293_v0 = vcombine.low %v1261_v13, %v1276_v60 }
 0x187   : > { %1474 = vrot.lane.b32.xlu1 %v632_v5, %s3281_s18  ;;  %1778 = vrot.lane.b32.xlu0 %v1285_v56, %s2232_s12  ;;  %v1301_v56 = vrot.slane %v1293_v0, %v2326_v32  ;;  %v849_v0 = vcombine.high %v2586_v25, %v3246_v36  ;;  %v914_v25 = vcombine.high %v2618_v15, %v3246_v36 }
 0x188   : > { %v916_v15 = vcombine.high %v2643_v37, %v3246_v36 }
 0x189   : > { %v2811_v8 = vpop.permute.xlu1 %1358  ;;  %v1311_v9 = vcombine.high %v1301_v56, %v3246_v36 }
 0x18b   : > { %1478 = vrot.lane.b32.xlu1 %v650_v50, %s2220_s17  ;;  %1782 = vrot.lane.b32.xlu0 %v1309_v34, %s3243_s22  ;;  %s3284_s22 = smov 112   ;;  %v1294_v50 = vcombine.high %v1261_v13, %v1276_v60  ;;  %v847_v60 = vcombine.high %v2429_v53, %v3246_v36  ;;  %v848_v13 = vcombine.high %v2575_v31, %v3246_v36 }
 0x18c   : > { %v913_v31 = vcombine.high %v2607_v51, %v3246_v36 }
 0x18d   : > { %v2820_v61 = vpop.permute.xlu1 %1366 }
 0x18f   : > { %1482 = vrot.lane.b32.xlu1 %v2385_v4, %s2222_s19  ;;  %1786 = vrot.lane.b32.xlu0 %v1292_v33, %s3282_s20  ;;  %v1308_v33 = vrot.slane %v1294_v50, %v2326_v32 }
 0x191   : > { %v2828_v29 = vpop.permute.xlu1 %1362  ;;  %v1312_v17 = vcombine.high %v1308_v33, %v3246_v36 }
 0x193   : > { %1490 = vrot.lane.b32.xlu1 %v2394_v28, %s3283_s5  ;;  %1790 = vrot.lane.b32.xlu0 %v1310_v26, %s3244_s23  ;;  %s3285_s23 = smov 124  }
 0x195   : > { %v2834_v5 = vpop.permute.xlu1 %1370 }
 0x197   : > { %1498 = vrot.lane.b32.xlu1 %v2415_v43, %s2228_s28  ;;  %1794 = vrot.lane.b32.xlu0 %v1301_v56, %s3284_s22  ;;  %v850_v56 = vcombine.high %v2597_v47, %v3246_v36  ;;  %v915_v47 = vcombine.high %v2630_v6, %v3246_v36 }
 0x199   : > { %v2840_v4 = vpop.permute.xlu1 %1374 }
 0x19b   : > { %1506 = vrot.lane.b32.xlu1 %v2437_v57, %s3279_s25  ;;  %1798 = vrot.lane.b32.xlu0 %v1311_v9, %s3245_s24  ;;  %s3286_s24 = smov 12  }
 0x19d   : > { %v2846_v28 = vpop.permute.xlu1 %1378 }
 0x19f   : > { %1514 = vrot.lane.b32.xlu1 %v2467_v23, %s2230_s13  ;;  %1802 = vrot.lane.b32.xlu0 %v1308_v33, %s2235_s21  ;;  %v2866_v23 = vpop.permute.xlu0 %1382 }
 0x1a1   : > { %v2852_v43 = vpop.permute.xlu1 %1386 }
 0x1a3   : > { %1522 = vrot.lane.b32.xlu1 %v2479_v10, %s2231_s16  ;;  %1806 = vrot.lane.b32.xlu0 %v1312_v17, %s3285_s23  ;;  %v2872_v10 = vpop.permute.xlu0 %1486 }
 0x1a5   : > { %v2858_v57 = vpop.permute.xlu1 %1390 }
 0x1a7   : > { %1530 = vrot.lane.b32.xlu1 %v2509_v58, %s2232_s12 }
 0x1a9   : > { %v2862_v32 = vpop.permute.xlu1 %1398 }
 0x1ab   : > { %1538 = vrot.lane.b32.xlu1 %v2530_v38, %s3282_s20  ;;  %v2882_v38 = vpop.permute.xlu0 %1494 }
 0x1ad   : > { %v2868_v34 = vpop.permute.xlu1 %1394 }
 0x1af   : > { %1546 = vrot.lane.b32.xlu1 %v2541_v49, %s3284_s22 }
 0x1b1   : > { %v2874_v12 = vpop.permute.xlu1 %1402 }
 0x1b3   : > { %1554 = vrot.lane.b32.xlu1 %v2553_v62, %s2235_s21  ;;  %v2892_v62 = vpop.permute.xlu0 %1502 }
 0x1b5   : > { %v2878_v58 = vpop.permute.xlu1 %1406 }
 0x1b7   : > { %1562 = vrot.lane.b32.xlu1 %v847_v60, %s2206_s26  ;;  %v2901_v9 = vpop.permute.xlu0 %1510  ;;  %s3287_s26 = smov 52  }
 0x1b9   : > { %v2887_v49 = vpop.permute.xlu1 %1410 }
 0x1bb   : > { %1570 = vrot.lane.b32.xlu1 %v848_v13, %s3286_s24  ;;  %v2911_v17 = vpop.permute.xlu0 %1518 }
 0x1bd   : > { %v2894_v26 = vpop.permute.xlu1 %1414 }
 0x1bf   : > { %1578 = vrot.lane.b32.xlu1 %v849_v0, %s2211_s2  ;;  %v2920_v0 = vpop.permute.xlu0 %1526  ;;  %s3288_s2 = smov 8  }
 0x1c1   : > { %v2899_v50 = vpop.permute.xlu1 %1418 }
 0x1c3   : > { %1586 = vrot.lane.b32.xlu1 %v850_v56, %s2212_s3  ;;  %v2928_v56 = vpop.permute.xlu0 %1534  ;;  %s3289_s3 = smov 32  }
 0x1c5   : > { %v2906_v33 = vpop.permute.xlu1 %1422 }
 0x1c7   : > { %1594 = vrot.lane.b32.xlu1 %v913_v31, %s2218_s15 }
 0x1c9   : > { %v2913_v60 = vpop.permute.xlu1 %1426 }
 0x1cb   : > { %1602 = vrot.lane.b32.xlu1 %v914_v25, %s2220_s17  ;;  %v2932_v25 = vpop.permute.xlu0 %1542 }
 0x1cd   : > { %v2918_v13 = vpop.permute.xlu1 %1430 }
 0x1cf   : > { %1610 = vrot.lane.b32.xlu1 %v915_v47, %s3287_s26  ;;  %v2938_v37 = vpop.permute.xlu0 %1550 }
 0x1d1   : > { %v2923_v51 = vpop.permute.xlu1 %1434 }
 0x1d3   : > { %1618 = vrot.lane.b32.xlu1 %v916_v15, %s3277_s6  ;;  %v2948_v53 = vpop.permute.xlu0 %1558 }
 0x1d5   : > { %v1439_v31 = vpop.permute.xlu1 %1438 }
 0x1d6   : > { %v1871_v36 = vsel %vm1809_vm0, %v2719_v11, %v1439_v31 }
 0x1d7   : > { %1690 = vrot.lane.b32.xlu1 %v2653_v35, %s3288_s2 }
 0x1d9   : > { %v1443_v6 = vpop.permute.xlu1 %1442 }
 0x1da   : > { %v1872_v35 = vsel %vm1811_vm1, %v1871_v36, %v1443_v6 }
 0x1db   : > { %1698 = vrot.lane.b32.xlu1 %v2664_v44, %s2209_s29  ;;  %s3294_s29 = smov 108  }
 0x1dd   : > { %v1447_v47 = vpop.permute.xlu1 %1446 }
 0x1de   : > { %v1873_v44 = vsel %vm1813_vm2, %v1872_v35, %v1447_v47 }
 0x1df   : > { %1706 = vrot.lane.b32.xlu1 %v2676_v18, %s2210_s30  ;;  %s3295_s30 = smov 116  }
 0x1e1   : > { %v1451_v15 = vpop.permute.xlu1 %1450 }
 0x1e2   : > { %v1874_v18 = vsel %vm1815_vm3, %v1873_v44, %v1451_v15 }
 0x1e3   : > { %1714 = vrot.lane.b32.xlu1 %v2688_v16, %s3289_s3  ;;  %v2955_v16 = vpop.permute.xlu0 %1566 }
 0x1e5   : > { %v1455_v27 = vpop.permute.xlu1 %1454 }
 0x1e6   : > { %v1875_v40 = vsel %vm1817_vm4, %v1874_v18, %v1455_v27 }
 0x1e7   : > { %1722 = vrot.lane.b32.xlu1 %v2699_v55, %s3281_s18  ;;  %v2961_v47 = vpop.permute.xlu0 %1574 }
 0x1e9   : > { %v1459_v11 = vpop.permute.xlu1 %1458 }
 0x1ea   : > { %v1876_v36 = vsel %vm1819_vm5, %v1875_v40, %v1459_v11  ;;  %v1810_v11 = vsel %vm1809_vm0, %v2333_v39, %v2733_v19 }
 0x1eb   : > { %1730 = vrot.lane.b32.xlu1 %v2709_v48, %s2222_s19  ;;  %v3290_v48 = vmov 0.0  }
 0x1ec   : > { %v979_v15 = vcombine.high %v2482_v45, %v3290_v48 }
 0x1ed   : > { %v1463_v31 = vpop.permute.xlu1 %1462 }
 0x1ee   : > { %v1877_v6 = vsel %vm1821_vm6, %v1876_v36, %v1463_v31 }
 0x1ef   : > { %1738 = vrot.lane.b32.xlu1 %v2722_v20, %s3283_s5  ;;  %v2969_v20 = vpop.permute.xlu0 %1582 }
 0x1f1   : > { %v1467_v27 = vpop.permute.xlu1 %1466 }
 0x1f2   : > { %v1878_v55 = vsel %vm3252_vm7, %v1877_v6, %v1467_v27  ;;  %v1812_v27 = vsel %vm1811_vm1, %v1810_v11, %v2715_v41 }
 0x1f3   : > { %1622 = vrot.lane.b32.xlu1 %v2482_v45, %s2228_s28  ;;  %v980_v45 = vcombine.high %v2485_v46, %v3290_v48  ;;  %v2980_v6 = vpop.permute.xlu0 %1590  ;;  %s3293_s28 = smov 100  }
 0x1f5   : > { %v1471_v40 = vpop.permute.xlu1 %1470 }
 0x1f6   : > { %v1879_v35 = vsel %vm3253_vm8, %v1878_v55, %v1471_v40  ;;  %v1814_v55 = vsel %vm1813_vm2, %v1812_v27, %v2744_v52 }
 0x1f7   : > { %1626 = vrot.lane.b32.xlu1 %v979_v15, %s3278_s4  ;;  %v1816_v39 = vsel %vm1815_vm3, %v1814_v55, %v2751_v3  ;;  %v2994_v15 = vpop.permute.xlu0 %1598  ;;  %s2084_s4 = sshll.u32 %s2192_s8, 2 }
 0x1f8   : > { %p184_p9 = scmp.lt.s32.totalorder %s2084_s4, 7 }
 0x1f9   : > { %v1475_v44 = vpop.permute.xlu1 %1474 }
 0x1fa   : > { %v1880_v18 = vsel %vm3254_vm9, %v1879_v35, %v1475_v44  ;;  %v981_v35 = vcombine.high %v2499_v1, %v3290_v48  ;;  %s3349_s4 = smov (!%p184_p9, %s2084_s4), 7 }
 0x1fb   : > { %1630 = vrot.lane.b32.xlu1 %v2485_v46, %s3279_s25  ;;  %v1818_v46 = vsel %vm1817_vm4, %v1816_v39, %v2768_v14  ;;  %s3291_s25 = smov 84   ;;  %s2085_s8 = sshll.u32 %s3349_s4, 1 }
 0x1fc   : > { %v1820_v3 = vsel %vm1819_vm5, %v1818_v46, %v2760_v54 }
 0x1fd   : > { %v1479_v36 = vpop.permute.xlu1 %1478  ;;  %v1822_v14 = vsel %vm1821_vm6, %v1820_v3, %v2776_v7 }
 0x1fe   : > { %v1881_v31 = vsel %vm3255_vm10, %v1880_v18, %v1479_v36  ;;  %v1824_v18 = vsel %vm3252_vm7, %v1822_v14, %v2784_v2  ;;  %v3013_v36 = vpop.permute.xlu0 %1606  ;;  %vm3259_vm7 = vcmask 556032  }
 0x1ff   : > { %1634 = vrot.lane.b32.xlu1 %v980_v45, %s3280_s27  ;;  %s3292_s27 = smov 92  }
 0x201   : > { %v1483_v40 = vpop.permute.xlu1 %1482 }
 0x202   : > { %v1882_v19 = vsel %vm3257_vm11, %v1881_v31, %v1483_v40 }
 0x203   : > { %1638 = vrot.lane.b32.xlu1 %v2499_v1, %s2230_s13  ;;  %v1883_v52 = vsel %vm3256_vm12, %v1882_v19, %v2872_v10  ;;  %v1826_v10 = vsel %vm3253_vm8, %v1824_v18, %v2799_v42  ;;  %vm3260_vm8 = vcmask 588800   ;;  %v1045_v19 = vcombine.high %v2515_v22, %v3290_v48 }
 0x204   : > { %v1828_v7 = vsel %vm3254_vm9, %v1826_v10, %v2790_v21  ;;  %vm1845_vm9 = vcmask 621568  }
 0x205   : > { %v1491_v41 = vpop.permute.xlu1 %1490  ;;  %v1830_v2 = vsel %vm3255_vm10, %v1828_v7, %v2805_v30  ;;  %vm3263_vm10 = vcmask 654336   ;;  %v3031_v30 = vpop.permute.xlu0 %1614 }
 0x206   : > { %v1884_v44 = vsel %vm1835_vm13, %v1883_v52, %v1491_v41  ;;  %v1832_v31 = vsel %vm3257_vm11, %v1830_v2, %v2811_v8  ;;  %vm3264_vm11 = vcmask 719872   ;;  %v3296_v2 = vld [vmem:[#allocation4_spill] sm:$0xff] }
 0x207   : > { %1642 = vrot.lane.b32.xlu1 %v981_v35, %s3291_s25  ;;  %v1885_v1 = vsel %vm3261_vm14, %v1884_v44, %v2882_v38  ;;  %v982_v38 = vcombine.high %v2512_v59, %v3290_v48  ;;  %v1834_v21 = vsel %vm3256_vm12, %v1832_v31, %v2828_v29  ;;  %vm3262_vm12 = vcmask 687104  }
 0x209   : > { %v1499_v11 = vpop.permute.xlu1 %1498  ;;  %v3051_v46 = vpop.permute.xlu0 %1686 }
 0x20a   : > { %v1886_v54 = vsel %vm3258_vm15, %v1885_v1, %v1499_v11  ;;  %v1047_v1 = vcombine.high %v2524_v63, %v3290_v48 }
 0x20b   : > { %1646 = vrot.lane.b32.xlu1 %v2512_v59, %s2231_s16  ;;  %v1887_v45 = vsel %vm3259_vm7, %v1886_v54, %v2892_v62  ;;  %v1836_v59 = vsel %vm1835_vm13, %v1834_v21, %v2820_v61 }
 0x20c   : > { %v1838_v40 = vsel %vm3261_vm14, %v1836_v59, %v2834_v5  ;;  %vm3272_vm14 = vcmask 850944  }
 0x20d   : > { %v1507_v42 = vpop.permute.xlu1 %1506  ;;  %v1840_v29 = vsel %vm3258_vm15, %v1838_v40, %v2840_v4  ;;  %vm1853_vm15 = vcmask 752640  }
 0x20e   : > { %v1888_v27 = vsel %vm3260_vm8, %v1887_v45, %v1507_v42  ;;  %v1842_v39 = vsel %vm3259_vm7, %v1840_v29, %v2846_v28  ;;  %vm3265_vm7 = vcmask 785408   ;;  %v3297_v42 = vld [vmem:[#allocation5_spill] sm:$0xff] }
 0x20f   : > { %1650 = vrot.lane.b32.xlu1 %v982_v38, %s3292_s27  ;;  %v1889_v62 = vsel %vm1845_vm9, %v1888_v27, %v2901_v9  ;;  %v1844_v4 = vsel %vm3260_vm8, %v1842_v39, %v2866_v23  ;;  %vm3266_vm8 = vcmask 818176   ;;  %v3067_v23 = vpop.permute.xlu0 %1694 }
 0x210   : > { %v1846_v28 = vsel %vm1845_vm9, %v1844_v4, %v2852_v43 }
 0x211   : > { %v1515_v55 = vpop.permute.xlu1 %1514 }
 0x212   : > { %v1890_v8 = vsel %vm3263_vm10, %v1889_v62, %v1515_v55 }
 0x213   : > { %1654 = vrot.lane.b32.xlu1 %v2515_v22, %s2232_s12  ;;  %v1891_v61 = vsel %vm3262_vm12, %v1890_v8, %v2911_v17  ;;  %v1848_v22 = vsel %vm3263_vm10, %v1846_v28, %v2858_v57  ;;  %vm3270_vm10 = vcmask 916480   ;;  %v1703_v11 = vpop.permute.xlu0 %1702  ;;  %s189_s12 = scalar_lea.vmem %s3217_s1, %s2085_s8 }
 0x214   : > { %v1850_v35 = vsel %vm3262_vm12, %v1848_v22, %v2868_v34  ;;  %vm3271_vm12 = vcmask 883712  }
 0x215   : > { %v1523_v9 = vpop.permute.xlu1 %1522  ;;  %v1852_v57 = vsel %vm3264_vm11, %v1850_v35, %v2862_v32 }
 0x216   : > { %v1892_v5 = vsel %vm3264_vm11, %v1891_v61, %v1523_v9  ;;  %v1854_v34 = vsel %vm1853_vm15, %v1852_v57, %v2874_v12  ;;  %vm3269_vm11 = vcmask 949248  }
 0x217   : > { %1658 = vrot.lane.b32.xlu1 %v1045_v19, %s3293_s28  ;;  %v1893_v17 = vsel %vm1853_vm15, %v1892_v5, %v2920_v0  ;;  %v1046_v0 = vcombine.high %v2518_v24, %v3290_v48  ;;  %v1856_v14 = vsel %vm3265_vm7, %v1854_v34, %v2878_v58 }
 0x219   : > { %v1531_v41 = vpop.permute.xlu1 %1530 }
 0x21a   : > { %v1894_v52 = vsel %vm3265_vm7, %v1893_v17, %v1531_v41  ;;  %vm3268_vm7 = vcmask 982016  }
 0x21b   : > { %1662 = vrot.lane.b32.xlu1 %v2518_v24, %s3282_s20  ;;  %v1895_v3 = vsel %vm3266_vm8, %v1894_v52, %v2928_v56  ;;  %v1858_v56 = vsel %vm3266_vm8, %v1856_v14, %v2887_v49  ;;  %vm3267_vm8 = vcmask 1014784  }
 0x21c   : > { %v1860_v32 = vsel %vm3272_vm14, %v1858_v56, %v2894_v26 }
 0x21d   : > { %v1539_v43 = vpop.permute.xlu1 %1538  ;;  %v1862_v10 = vsel %vm3271_vm12, %v1860_v32, %v2899_v50 }
 0x21e   : > { %v1896_v44 = vsel %vm3272_vm14, %v1895_v3, %v1539_v43  ;;  %v1864_v58 = vsel %vm3270_vm10, %v1862_v10, %v2906_v33  ;;  %vm3303_vm14 = vcmask 424960  }
 0x21f   : > { %1666 = vrot.lane.b32.xlu1 %v1046_v0, %s3294_s29  ;;  %v1897_v24 = vsel %vm3271_vm12, %v1896_v44, %v2932_v25  ;;  %v1866_v49 = vsel %vm3269_vm11, %v1864_v58, %v2913_v60  ;;  %vm3302_vm12 = vcmask 392192   ;;  %v3305_v0 = vld [vmem:[#allocation6_spill] sm:$0xff] }
 0x220   : > { %v1868_v50 = vsel %vm3268_vm7, %v1866_v49, %v2918_v13  ;;  %v1933_v57 = vsel %vm1809_vm0, %v3305_v0, %v3051_v46 }
 0x221   : > { %v1547_v18 = vpop.permute.xlu1 %1546  ;;  %v3105_v7 = vsel %vm3267_vm8, %v1868_v50, %v2923_v51 }
 0x222   : > { %v1898_v12 = vsel %vm3270_vm10, %v1897_v24, %v1547_v18  ;;  %vm3301_vm10 = vcmask 359424  }
 0x223   : > { %1670 = vrot.lane.b32.xlu1 %v2524_v63, %s3284_s22  ;;  %v1899_v26 = vsel %vm3269_vm11, %v1898_v12, %v2938_v37  ;;  %v1711_v37 = vpop.permute.xlu0 %1710  ;;  %vm3300_vm11 = vcmask 326656  }
 0x225   : > { %v1555_v25 = vpop.permute.xlu1 %1554 }
 0x226   : > { %v1900_v54 = vsel %vm3268_vm7, %v1899_v26, %v1555_v25  ;;  %vm3299_vm7 = vcmask 293888  }
 0x227   : > { %v3109_v33 = vsel %vm3267_vm8, %v1900_v54, %v2948_v53  ;;  %1674 = vrot.lane.b32.xlu1 %v1047_v1, %s3295_s30  ;;  %v1048_v53 = vcombine.high %v3297_v42, %v3290_v48  ;;  %v1719_v31 = vpop.permute.xlu0 %1718  ;;  %vm3298_vm8 = vcmask 261120  }
 0x228   : > { %v1968_v60 = vcombine.low %v3105_v7, %v3109_v33 }
 0x229   : > { %v1563_v63 = vpop.permute.xlu1 %1562 }
 0x22a   : > { %v1902_v13 = vsel %vm1809_vm0, %v3296_v2, %v1563_v63  ;;  %vm3307_vm0 = vcmask 293888  }
 0x22b   : > { %1678 = vrot.lane.b32.xlu1 %v3297_v42, %s2235_s21  ;;  %v1903_v51 = vsel %vm1811_vm1, %v1902_v13, %v2955_v16  ;;  %v1727_v62 = vpop.permute.xlu0 %1726 }
 0x22d   : > { %v1571_v45 = vpop.permute.xlu1 %1570 }
 0x22e   : > { %v1904_v38 = vsel %vm1813_vm2, %v1903_v51, %v1571_v45 }
 0x22f   : > { %1682 = vrot.lane.b32.xlu1 %v1048_v53, %s3285_s23  ;;  %v1905_v21 = vsel %vm1815_vm3, %v1904_v38, %v2961_v47  ;;  %v1735_v39 = vpop.permute.xlu0 %1734 }
 0x231   : > { %v1579_v27 = vpop.permute.xlu1 %1578 }
 0x232   : > { %v1906_v55 = vsel %vm1817_vm4, %v1905_v21, %v1579_v27 }
 0x233   : > { %v1907_v8 = vsel %vm1819_vm5, %v1906_v55, %v2969_v20  ;;  %v1743_v19 = vpop.permute.xlu0 %1742 }
 0x235   : > { %v1587_v59 = vpop.permute.xlu1 %1586 }
 0x236   : > { %v1908_v16 = vsel %vm1821_vm6, %v1907_v8, %v1587_v59 }
 0x237   : > { %v1909_v48 = vsel %vm3298_vm8, %v1908_v16, %v2980_v6  ;;  %vm3304_vm8 = vcmask 490496   ;;  %v1747_v17 = vpop.permute.xlu0 %1746 }
 0x239   : > { %v1595_v40 = vpop.permute.xlu1 %1594 }
 0x23a   : > { %v1910_v29 = vsel %vm3299_vm7, %v1909_v48, %v1595_v40  ;;  %vm3306_vm7 = vcmask 261120  }
 0x23b   : > { %v1911_v47 = vsel %vm3300_vm11, %v1910_v29, %v2994_v15  ;;  %v1751_v52 = vpop.permute.xlu0 %1750 }
 0x23d   : > { %v1603_v9 = vpop.permute.xlu1 %1602 }
 0x23e   : > { %v1912_v61 = vsel %vm3301_vm10, %v1911_v47, %v1603_v9 }
 0x23f   : > { %v1913_v20 = vsel %vm3302_vm12, %v1912_v61, %v3013_v36  ;;  %v1755_v43 = vpop.permute.xlu0 %1754 }
 0x241   : > { %v1611_v5 = vpop.permute.xlu1 %1610 }
 0x242   : > { %v1914_v4 = vsel %vm3303_vm14, %v1913_v20, %v1611_v5 }
 0x243   : > { %v1915_v6 = vsel %vm1835_vm13, %v1914_v4, %v3031_v30  ;;  %v1759_v44 = vpop.permute.xlu0 %1758 }
 0x245   : > { %v1619_v28 = vpop.permute.xlu1 %1618 }
 0x246   : > { %v1916_v41 = vsel %vm3304_vm8, %v1915_v6, %v1619_v28 }
 0x247   : > { %v1763_v24 = vpop.permute.xlu0 %1762 }
 0x249   : > { %v1691_v22 = vpop.permute.xlu1 %1690 }
 0x24a   : > { %v1934_v36 = vsel %vm1811_vm1, %v1933_v57, %v1691_v22  ;;  %vm3308_vm1 = vmmov %vm3300_vm11  ;;  %vm3315_vm11 = vcmask 588800  }
 0x24b   : > { %v1935_v30 = vsel %vm1813_vm2, %v1934_v36, %v3067_v23  ;;  %v1767_v58 = vpop.permute.xlu0 %1766  ;;  %vm3309_vm2 = vmmov %vm3301_vm10  ;;  %vm3314_vm10 = vcmask 556032  }
 0x24d   : > { %v1699_v35 = vpop.permute.xlu1 %1698 }
 0x24e   : > { %v1936_v14 = vsel %vm1815_vm3, %v1935_v30, %v1699_v35  ;;  %vm3310_vm3 = vmmov %vm3302_vm12  ;;  %vm3316_vm12 = vcmask 654336  }
 0x24f   : > { %v1937_v18 = vsel %vm1817_vm4, %v1936_v14, %v1703_v11  ;;  %v1771_v50 = vpop.permute.xlu0 %1770  ;;  %vm3311_vm4 = vmmov %vm3303_vm14  ;;  %vm3318_vm14 = vcmask 719872  }
 0x251   : > { %v1707_v15 = vpop.permute.xlu1 %1706 }
 0x252   : > { %v1938_v32 = vsel %vm1819_vm5, %v1937_v18, %v1707_v15  ;;  %vm3312_vm5 = vmmov %vm3304_vm8  ;;  %vm3319_vm8 = vcmask 785408  }
 0x253   : > { %v1939_v10 = vsel %vm1821_vm6, %v1938_v32, %v1711_v37  ;;  %v1775_v37 = vpop.permute.xlu0 %1774  ;;  %vm3313_vm6 = vcmask 523264  }
 0x255   : > { %v1715_v3 = vpop.permute.xlu1 %1714 }
 0x256   : > { %v1940_v46 = vsel %vm3306_vm7, %v1939_v10, %v1715_v3  ;;  %vm3320_vm7 = vcmask 818176  }
 0x257   : > { %v1941_v25 = vsel %vm3307_vm0, %v1940_v46, %v1719_v31  ;;  %v1779_v53 = vpop.permute.xlu0 %1778  ;;  %vm3321_vm0 = vmmov %vm3313_vm6 }
 0x259   : > { %v1723_v34 = vpop.permute.xlu1 %1722 }
 0x25a   : > { %v1942_v26 = vsel %vm3308_vm1, %v1941_v25, %v1723_v34  ;;  %vm3322_vm1 = vcmask 850944  }
 0x25b   : > { %v1943_v1 = vsel %vm3309_vm2, %v1942_v26, %v1727_v62  ;;  %v1783_v21 = vpop.permute.xlu0 %1782  ;;  %vm3323_vm2 = vmmov %vm3314_vm10 }
 0x25d   : > { %v1731_v56 = vpop.permute.xlu1 %1730 }
 0x25e   : > { %v1944_v11 = vsel %vm3310_vm3, %v1943_v1, %v1731_v56  ;;  %vm3324_vm3 = vmmov %vm3315_vm11 }
 0x25f   : > { %v1945_v63 = vsel %vm3311_vm4, %v1944_v11, %v1735_v39  ;;  %v1787_v16 = vpop.permute.xlu0 %1786  ;;  %vm3325_vm4 = vcmask 883712  }
 0x261   : > { %v1739_v12 = vpop.permute.xlu1 %1738 }
 0x262   : > { %v1946_v2 = vsel %vm1835_vm13, %v1945_v63, %v1739_v12  ;;  %vm3317_vm13 = vcmask 687104  }
 0x263   : > { %v1947_v42 = vsel %vm3312_vm5, %v1946_v2, %v1743_v19  ;;  %v1791_v39 = vpop.permute.xlu0 %1790  ;;  %vm3326_vm5 = vmmov %vm3316_vm12 }
 0x264   : > { %v1948_v45 = vsel %vm3313_vm6, %v1947_v42, %v1747_v17  ;;  %vm3327_vm6 = vmmov %vm3317_vm13 }
 0x265   : > { %v1623_v49 = vpop.permute.xlu1 %1622  ;;  %v1949_v38 = vsel %vm3314_vm10, %v1948_v45, %v1751_v52  ;;  %vm3328_vm10 = vmmov %vm3318_vm14 }
 0x266   : > { %v1950_v27 = vsel %vm3315_vm11, %v1949_v38, %v1755_v43  ;;  %v1917_v28 = vsel %vm3321_vm0, %v1916_v41, %v1623_v49  ;;  %vm3329_vm11 = vcmask 916480   ;;  %vm3336_vm0 = vcmask 982016  }
 0x267   : > { %v1951_v62 = vsel %vm1845_vm9, %v1950_v27, %v1759_v44  ;;  %v1795_v5 = vpop.permute.xlu0 %1794 }
 0x268   : > { %v1952_v59 = vsel %vm3316_vm12, %v1951_v62, %v1763_v24  ;;  %vm3330_vm12 = vmmov %vm3319_vm8 }
 0x269   : > { %v1627_v23 = vpop.permute.xlu1 %1626  ;;  %v1953_v40 = vsel %vm3317_vm13, %v1952_v59, %v1767_v58  ;;  %vm3331_vm13 = vmmov %vm3320_vm7 }
 0x26a   : > { %v1954_v29 = vsel %vm3318_vm14, %v1953_v40, %v1771_v50  ;;  %v1918_v17 = vsel %vm3323_vm2, %v1917_v28, %v1627_v23  ;;  %vm3333_vm14 = vmmov %vm3322_vm1  ;;  %vm3339_vm2 = vcmask 1014784   ;;  %v3341_v50 = vld [vmem:[#allocation3_spill] sm:$0xff] }
 0x26b   : > { %v1955_v47 = vsel %vm1853_vm15, %v1954_v29, %v1775_v37  ;;  %v1799_v22 = vpop.permute.xlu0 %1798  ;;  %v1976_v11 = vrot.slane %v1968_v60, %v3341_v50 }
 0x26c   : > { %v1956_v19 = vsel %vm3319_vm8, %v1955_v47, %v1779_v53  ;;  %vm3334_vm8 = vmmov %vm3325_vm4 }
 0x26d   : > { %v1631_v54 = vpop.permute.xlu1 %1630  ;;  %v1957_v20 = vsel %vm3320_vm7, %v1956_v19, %v1783_v21  ;;  %vm3335_vm7 = vmmov %vm3329_vm11 }
 0x26e   : > { %v1958_v6 = vsel %vm3322_vm1, %v1957_v20, %v1787_v16  ;;  %v1919_v52 = vsel %vm3324_vm3, %v1918_v17, %v1631_v54  ;;  %vm3340_vm3 = vmmov %vm3339_vm2 }
 0x26f   : > { %v1959_v43 = vsel %vm3325_vm4, %v1958_v6, %v1791_v39  ;;  %v1803_v34 = vpop.permute.xlu0 %1802 }
 0x270   : > { %v1960_v36 = vsel %vm3329_vm11, %v1959_v43, %v1795_v5 }
 0x271   : > { %v1635_v13 = vpop.permute.xlu1 %1634 }
 0x272   : > { %v1920_v15 = vsel %vm1845_vm9, %v1919_v52, %v1635_v13  ;;  %vm3332_vm9 = vcmask 949248  }
 0x273   : > { %v1961_v56 = vsel %vm3332_vm9, %v1960_v36, %v1799_v22  ;;  %vm3337_vm1 = vmmov %vm3332_vm9  ;;  %v1807_v58 = vpop.permute.xlu0 %1806 }
 0x274   : > { %v1962_v10 = vsel %vm3336_vm0, %v1961_v56, %v1803_v34 }
 0x275   : > { %v1639_v51 = vpop.permute.xlu1 %1638  ;;  %v1963_v23 = vsel %vm3340_vm3, %v1962_v10, %v1807_v58 }
 0x276   : > { %v1921_v3 = vsel %vm3326_vm5, %v1920_v15, %v1639_v51 }
 0x279   : > { %v1643_v31 = vpop.permute.xlu1 %1642 }
 0x27a   : > { %v1922_v0 = vsel %vm3327_vm6, %v1921_v3, %v1643_v31 }
 0x27d   : > { %v1647_v55 = vpop.permute.xlu1 %1646 }
 0x27e   : > { %v1923_v57 = vsel %vm3328_vm10, %v1922_v0, %v1647_v55 }
 0x281   : > { %v1651_v8 = vpop.permute.xlu1 %1650 }
 0x282   : > { %v1924_v44 = vsel %vm1853_vm15, %v1923_v57, %v1651_v8  ;;  %vm3338_vm15 = vmmov %vm3336_vm0 }
 0x285   : > { %v1655_v48 = vpop.permute.xlu1 %1654 }
 0x286   : > { %v1925_v30 = vsel %vm3330_vm12, %v1924_v44, %v1655_v48 }
 0x289   : > { %v1659_v9 = vpop.permute.xlu1 %1658 }
 0x28a   : > { %v1926_v14 = vsel %vm3331_vm13, %v1925_v30, %v1659_v9 }
 0x28d   : > { %v1663_v61 = vpop.permute.xlu1 %1662 }
 0x28e   : > { %v1927_v18 = vsel %vm3333_vm14, %v1926_v14, %v1663_v61 }
 0x291   : > { %v1667_v4 = vpop.permute.xlu1 %1666 }
 0x292   : > { %v1928_v32 = vsel %vm3334_vm8, %v1927_v18, %v1667_v4 }
 0x295   : > { %v1671_v35 = vpop.permute.xlu1 %1670 }
 0x296   : > { %v1929_v12 = vsel %vm3335_vm7, %v1928_v32, %v1671_v35 }
 0x299   : > { %v1675_v41 = vpop.permute.xlu1 %1674 }
 0x29a   : > { %v1930_v46 = vsel %vm3337_vm1, %v1929_v12, %v1675_v41 }
 0x29d   : > { %v1679_v24 = vpop.permute.xlu1 %1678 }
 0x29e   : > { %v1931_v49 = vsel %vm3338_vm15, %v1930_v46, %v1679_v24 }
 0x2a1   : > { %v1683_v25 = vpop.permute.xlu1 %1682 }
 0x2a2   : > { %v1932_v26 = vsel %vm3339_vm2, %v1931_v49, %v1683_v25 }
 0x2a3   : > { %v1969_v1 = vcombine.low %v1932_v26, %v1963_v23 }
 0x2a5   : > { %v1983_v54 = vrot.slane %v1969_v1, %v3341_v50 }
 0x2a7   : > { %v1984_v63 = vcombine.low %v1976_v11, %v1983_v54 }
 0x2a9   : > { %1986 = vst [vmem:[%s189_s12] sm:$0xff] %v1984_v63 }
 0x2aa PF: > { %s11_s10 = sadd.s32 1, %s2200_s10   ;;  %s3342_s6 = smov %s2188_s7 }
 0x2ab   : > { %p8_p10 = scmp.ge.s32.totalorder %s11_s10, 4   ;;  %s3343_s7 = smov %s2281_s14 }
 0x2ac   : > { %s3344_s8 = smov %s2196_s9  ;;  %s3345_s9 = smov %s3347_s11 }
 0x2ad   :  { %10 = sbr.rel (!%p8_p10) target bundleno = 3 (0x3), region = 100 }

</bundles_post_ra>
